<compile_context>
chip_gen: v7x
topology: tpu7x:2x2x1
jax: 0.10.0
libtpu: 0.0.40
codegen_flags: <defaults>
</compile_context>

<pallas_src>
import jax
import jax.numpy as jnp
from jax.experimental import pallas as pl
from jax.experimental.pallas import tpu as pltpu

_MIB = 1024 * 1024


def _contrastive_loss_kernel(x_ref, o_ref):
    x = x_ref[...]  # (TN, C) logits tile in native dtype
    if x.dtype == jnp.bfloat16:
        # bf16 compute path (v6e/v7x have bf16 VPU/EUP; older gens convert internally):
        # max / subtract / exp stay packed bf16, accumulation happens in f32.
        m = jnp.max(x, axis=-1, keepdims=True)                              # (TN, 1) bf16
        p = jnp.exp(x - m)                                                  # (TN, C) bf16 (EUP)
        s = jnp.sum(p.astype(jnp.float32), axis=-1, keepdims=True)          # (TN, 1) f32
        lse = jnp.log(s) + m.astype(jnp.float32)
        x0 = x[:, 0:1].astype(jnp.float32)
    else:
        xf = x.astype(jnp.float32)
        m = jnp.max(xf, axis=-1, keepdims=True)                             # (TN, 1)
        s = jnp.sum(jnp.exp(xf - m), axis=-1, keepdims=True)                # (TN, 1)
        lse = jnp.log(s) + m
        x0 = xf[:, 0:1]
    o_ref[...] = lse - x0                                                   # (TN, 1) per-row loss


def _tpu_vmem_capacity_bytes():
    try:
        return int(pltpu.get_tpu_info().vmem_capacity_bytes)
    except Exception:
        return 64 * _MIB  # conservative fallback: smallest current VMEM (v7x per-TC)


def _vmem_limit_bytes():
    cap = _tpu_vmem_capacity_bytes()
    # ~112 MiB on 128-MiB chips (v5e/v6e), ~48 MiB on 64-MiB v7x; never below 32 MiB.
    return max(32 * _MIB, min(cap - 16 * _MIB, 112 * _MIB))


def _choose_row_tile(n, c, itemsize, vmem_limit, *,
                     target_block_bytes=8 * _MIB, min_grid_steps=4):
    """Row-tile size chosen by block bytes, sublane-aligned, VMEM-capped."""
    row_bytes = c * itemsize
    sublane = max(8, 32 // itemsize)          # 8 for f32, 16 for bf16/f16, 32 for int8/fp8
    if n <= sublane:
        return n                              # block equals full row extent: always legal
    # Hard cap: double-buffered input + full-tile elementwise temporaries must fit VMEM.
    # TODO(synk): for C so wide that even `sublane` rows exceed this cap, add an inner
    # 'arbitrary' grid axis over C with an online (running max/sum) logsumexp.
    cap_bytes = max(sublane * row_bytes, vmem_limit // 6)
    blk_bytes = min(target_block_bytes, cap_bytes)
    # Keep >= min_grid_steps grid steps so double-buffering overlaps DMA with compute.
    blk_bytes = min(blk_bytes, max(sublane * row_bytes, (n * row_bytes) // min_grid_steps))
    tile = max(sublane, (blk_bytes // row_bytes) // sublane * sublane)
    tile = min(tile, ((n + sublane - 1) // sublane) * sublane)
    return tile


def contrastive_loss(inputs, reduction="mean"):
    """Pallas equivalent of ContrastiveLoss.forward(inputs) for 2-D (N, C) logits."""
    if reduction not in ("mean", "sum", "none"):
        raise NotImplementedError(f"reduction={reduction!r} not supported")
    n, c = inputs.shape
    vmem_limit = _vmem_limit_bytes()
    tile = _choose_row_tile(n, c, inputs.dtype.itemsize, vmem_limit)
    grid = (pl.cdiv(n, tile),)

    per_row = pl.pallas_call(
        _contrastive_loss_kernel,
        out_shape=jax.ShapeDtypeStruct((n, 1), jnp.float32),
        grid_spec=pltpu.PrefetchScalarGridSpec(
            num_scalar_prefetch=0,
            grid=grid,
            in_specs=[pl.BlockSpec((tile, c), lambda i: (i, 0))],
            out_specs=pl.BlockSpec((tile, 1), lambda i: (i, 0)),
        ),
        compiler_params=pltpu.CompilerParams(
            dimension_semantics=("parallel",),     # independent tiles -> megacore on v7x
            vmem_limit_bytes=vmem_limit,
        ),
    )(inputs)

    per_row = per_row[:, 0]
    if reduction == "none":
        return per_row
    total = jnp.sum(per_row)
    return total / n if reduction == "mean" else total


def _reference_loss(inputs, reduction="mean"):
    x = inputs.astype(jnp.float32)
    lse = jax.nn.logsumexp(x, axis=-1)
    per_row = lse - x[:, 0]
    if reduction == "none":
        return per_row
    return jnp.mean(per_row) if reduction == "mean" else jnp.sum(per_row)


if __name__ == "__main__":
    key = jax.random.PRNGKey(0)
    k0, k1, k2 = jax.random.split(key, 3)

    # 1) Small lane-aligned case: batch=8 rows, 128 "classes" (1 positive + 127 negatives).
    x = jax.random.normal(k0, (8, 128), dtype=jnp.float32)
    loss = jax.block_until_ready(contrastive_loss(x, reduction="mean"))
    ref = _reference_loss(x, reduction="mean")
    assert jnp.allclose(loss, ref, rtol=1e-5, atol=1e-5), (loss, ref)

    # per-row ('none') path on the same input
    pr = jax.block_until_ready(contrastive_loss(x, reduction="none"))
    pr_ref = _reference_loss(x, reduction="none")
    assert jnp.allclose(pr, pr_ref, rtol=1e-5, atol=1e-5)

    # 2) Multi-tile parallel grid with a ragged remainder tile (N=300 -> 5 tiles of 72).
    x2 = jax.random.normal(k1, (300, 128), dtype=jnp.float32)
    loss2 = jax.block_until_ready(contrastive_loss(x2, reduction="sum"))
    ref2 = _reference_loss(x2, reduction="sum")
    assert jnp.allclose(loss2, ref2, rtol=1e-5, atol=1e-3), (loss2, ref2)

    # 3) bf16 streaming with bf16 max/sub/exp and f32 accumulation (4 tiles of 16 rows).
    x3 = jax.random.normal(k2, (64, 256), dtype=jnp.bfloat16)
    loss3 = jax.block_until_ready(contrastive_loss(x3, reduction="mean"))
    ref3 = _reference_loss(x3, reduction="mean")
    assert jnp.allclose(loss3, ref3, rtol=2e-2, atol=2e-2), (loss3, ref3)

    print("KERNEL_OK")
</pallas_src>

<mosaic_0001>
module attributes {stable_mosaic.version = 11 : i64} {
  func.func @_contrastive_loss_kernel(%arg0: i32, %arg1: memref<8x128xf32, #tpu.memory_space<vmem>>, %arg2: memref<8x1xf32, #tpu.memory_space<vmem>>) attributes {dimension_semantics = [#tpu.dimension_semantics<parallel>], iteration_bounds = array<i64: 1>, scalar_prefetch = 0 : i64, scratch_operands = 0 : i64, tpu.core_type = #tpu.core_type<tc>, window_params = [{transform_indices = @transform_0, window_bounds = array<i64: 8, 128>}, {transform_indices = @transform_1, window_bounds = array<i64: 8, 1>}]} {
    %c0 = arith.constant 0 : index
    %c0_0 = arith.constant 0 : index
    %0 = vector.load %arg1[%c0, %c0_0] : memref<8x128xf32, #tpu.memory_space<vmem>>, vector<8x128xf32>
    %cst = arith.constant dense<0xFF800000> : vector<8xf32>
    %1 = vector.multi_reduction <maximumf>, %0, %cst [1] : vector<8x128xf32> to vector<8xf32>
    %2 = vector.shape_cast %1 : vector<8xf32> to vector<8x1xf32>
    %3 = vector.broadcast %2 : vector<8x1xf32> to vector<8x128xf32>
    %4 = arith.subf %0, %3 : vector<8x128xf32>
    %5 = math.exp %4 : vector<8x128xf32>
    %cst_1 = arith.constant dense<0.000000e+00> : vector<8xf32>
    %6 = vector.multi_reduction <add>, %5, %cst_1 [1] : vector<8x128xf32> to vector<8xf32>
    %7 = vector.shape_cast %6 : vector<8xf32> to vector<8x1xf32>
    %8 = math.log %7 : vector<8x1xf32>
    %9 = arith.addf %8, %2 : vector<8x1xf32>
    %10 = vector.extract_strided_slice %0 {offsets = [0, 0], sizes = [8, 1], strides = [1, 1]} : vector<8x128xf32> to vector<8x1xf32>
    %11 = arith.subf %9, %10 : vector<8x1xf32>
    %c0_2 = arith.constant 0 : index
    %c0_3 = arith.constant 0 : index
    %12 = vector.load %arg2[%c0_2, %c0_3] : memref<8x1xf32, #tpu.memory_space<vmem>>, vector<8x1xf32>
    tpu.vector_store %arg2[%c0_2, %c0_3], %11 {strides = array<i32>} : memref<8x1xf32, #tpu.memory_space<vmem>>, vector<8x1xf32>,
    return
  }
  func.func @transform_0(%arg0: i32) -> (i32, i32) {
    %c0_i32 = arith.constant 0 : i32
    %c0_i32_0 = arith.constant 0 : i32
    return %arg0, %c0_i32 : i32, i32
  }
  func.func @transform_1(%arg0: i32) -> (i32, i32) {
    %c0_i32 = arith.constant 0 : i32
    %c0_i32_0 = arith.constant 0 : i32
    return %arg0, %c0_i32 : i32, i32
  }
}

</mosaic_0001>

<bundles_post_ra>
// kernel: tpu_custom_call.1
= control target key start
LH: loop header
LB: loop body
LE: loop exit
PB: predicated region body
PF: predicated region fallthrough
CT: control target
= control target key end

     0   :  { %6 = vsyncpa [#allocation3], 0  ;;  %s68_s6 = smov [#allocation2]   ;;  %s94_s0 = inlined_call_operand.hbm [shape: f32[8,128], index: 0, kind: input, shape index: {}]   ;;  %s95_s1 = inlined_call_operand.vmem [shape: f32[8,1], index: 1, kind: output, shape index: {}]  }
   0x1   :  { %s13_s7 = sshll.u32 %s68_s6, 4  ;;  %s44_s10 = scalar_lea.hbm %s94_s0, 128  ;;  %s14_s7 = int_to_ptr.vmem [resolvable:$true] %s13_s7 }
   0x2   :  { %p45_p0 = scmp.ne.s32.totalorder %s94_s0, %s44_s10  ;;  %p48_p1 = scmp.lt.u32.totalorder %s44_s10, %s94_s0 }
   0x4   :  { %p50_p2 = pnand %p48_p1, %p45_p0 }
   0x6   :  { %53 = shalt.err (!%p50_p2)
}
   0x7   :  { %s54_s15 = scalar_lea.vmem %s14_s7, 128  ;;  %p59_p4 = scmp.lt.s32.totalorder %s14_s7, %s14_s7 }
   0x8   :  { %p55_p3 = scmp.ne.s32.totalorder %s14_s7, %s54_s15  ;;  %p60_p5 = scmp.lt.s32.totalorder %s54_s15, %s54_s15 }
   0xa   :  { %p61_p6 = por %p60_p5, %p59_p4 }
   0xc   :  { %p62_p7 = pnand %p61_p6, %p55_p3 }
   0xe   :  { %65 = shalt.err (!%p62_p7)
}
   0xf   :  { %16 = dma.hbm_to_vmem [thread:$0]  %s94_s0, 128, %s14_s7, [#allocation3]  }
  0x10   :  { %66 = dma.done.wait [#allocation3], 128  }
  0x11   :  { %67 = vsyncadd [#allocation3], 4294967168  ;;  %v20_v0 = vld [vmem:[#allocation2] sm:$0xff]  ;;  %vm32_vm0 = vcmask 7168  }
  0x12   :  { %21 = vmax.xlane.f32.xlu0 %v20_v0 }
  0x9f   :  { %v22_v1 = vpop.xlane.xlu0 %21 }
  0xa0   :  { %v23_v2 = vsub.f32 %v20_v0, %v22_v1 }
  0xa2   :  { %v24_v3 = vmul.f32 1.442695, %v23_v2 }
  0xa4   :  { %40 = vpow2.f32 %v24_v3 }
  0xae   :  { %v41_v4 = vpop.eup %40 }
  0xaf   :  { %26 = vadd.xlane.f32.xlu0 %v41_v4 }
 0x13c   :  { %v27_v5 = vpop.xlane.xlu0 %26 }
 0x13d   :  { %42 = vlog2.f32 %v27_v5 }
 0x147   :  { %v43_v6 = vpop.eup %42 }
 0x148   :  { %v29_v7 = vmul.f32 0.6931472, %v43_v6 }
 0x14a   :  { %v30_v8 = vadd.f32 %v29_v7, %v22_v1 }
 0x14c   :  { %v31_v9 = vsub.f32 %v30_v8, %v20_v0 }
 0x14e   :  { %33 = vst.msk [vmem:[%s95_s1] sm:$0xff] %vm32_vm0, %v31_v9 }
 0x14f   :  { %38 = vsyncpa [#allocation3], 1 }

</bundles_post_ra>
